<compile_context>
chip_gen: v6e
topology: v6e:2x2x1
jax: 0.10.0
libtpu: 0.0.40
codegen_flags: <defaults>
</compile_context>

<pallas_src>
import functools

import jax
import jax.numpy as jnp
from jax.experimental import pallas as pl
from jax.experimental.pallas import tpu as pltpu

# Constants from the original example
CNV_OUT_CH_POOL = [(64, False), (64, True), (128, False), (128, True), (256, False), (256, False)]
SPLIT_INDEX = 1
KERNEL_SIZE = 3
BN_EPS = 1e-4


def _quant_params(bit_width: int):
    # Brevitas CommonActQuant with min_val=-1.0, max_val=1.0-2^-7, narrow_range=True:
    # CONST scaling = max(|min_val|, |max_val|) = 1.0, int range = [-(2^(b-1)-1), 2^(b-1)-1]
    qmax = float(2 ** (bit_width - 1) - 1)
    return 1.0 / qmax, qmax  # (scale, qmax)


def _conv_bn_quant_kernel(x_ref, w_ref, c_ref, o_ref, *, kh, oh, wcin, qmax, scale):
    # x_ref: (1, H, W*Cin)   one image (rows oh..oh+KH-1 are the "halo" for the conv)
    # w_ref: (KH*W*Cin, OW*Cout)   width-Toeplitz weights, BN scale and 1/qscale pre-folded
    # c_ref: (1, OW*Cout)          fused conv-bias + BN offset, pre-scaled by 1/qscale
    # o_ref: (1, OH, OW*Cout)
    x = x_ref[0]                                                  # (H, W*Cin)
    acc = jnp.dot(x[0:oh, :], w_ref[0:wcin, :], preferred_element_type=jnp.float32)
    for i in range(1, kh):                                        # KH shifted dots (unrolled)
        acc = acc + jnp.dot(
            x[i:i + oh, :], w_ref[i * wcin:(i + 1) * wcin, :],
            preferred_element_type=jnp.float32,
        )
    z = acc + c_ref[...]                                          # conv + bias + BN, in quant units
    q = jnp.clip(jnp.round(z), -qmax, qmax)                       # round-half-even + narrow clamp
    o_ref[0] = (q * scale).astype(o_ref.dtype)                    # dequantize


def init_params(key, in_ch: int):
    """Deterministic synthetic parameters mirroring ClearModule.__init__ shapes."""
    assert SPLIT_INDEX == 1, "this kernel implements the SPLIT_INDEX=1 configuration"
    out_ch, _is_pool = CNV_OUT_CH_POOL[0]
    k = jax.random.split(key, 6)
    w = jax.random.normal(k[0], (out_ch, in_ch, KERNEL_SIZE, KERNEL_SIZE), jnp.float32) * 0.1
    b = jax.random.normal(k[1], (out_ch,), jnp.float32) * 0.05
    gamma = 1.0 + 0.1 * jax.random.normal(k[2], (out_ch,), jnp.float32)
    beta = 0.05 * jax.random.normal(k[3], (out_ch,), jnp.float32)
    running_mean = 0.1 * jax.random.normal(k[4], (out_ch,), jnp.float32)
    running_var = 1.0 + 0.1 * jax.random.uniform(k[5], (out_ch,), jnp.float32)
    return dict(w=w, b=b, gamma=gamma, beta=beta, rmean=running_mean, rvar=running_var)


def _lower_weights(params, w_spatial: int, out_bit_width: int, matmul_dtype):
    """Fold conv bias + eval-BN + 1/quant_scale into width-Toeplitz matmul weights."""
    w, b = params["w"], params["b"]
    a = params["gamma"] / jnp.sqrt(params["rvar"] + BN_EPS)       # BN per-channel scale
    c = (b - params["rmean"]) * a + params["beta"]                # conv bias + BN offset
    cout, cin, kh, kw = w.shape
    ow = w_spatial - kw + 1
    scale, qmax = _quant_params(out_bit_width)

    # (KH, KW, Cin, Cout), with BN scale and 1/quant_scale folded in.
    wq = jnp.transpose(w * (a * qmax)[:, None, None, None], (2, 3, 1, 0))
    # E[j, wcol, ow] = 1 iff wcol == ow + j  -> block-Toeplitz along the image width.
    eye = jnp.stack([jnp.eye(w_spatial, ow, k=-j, dtype=jnp.float32) for j in range(kw)])
    wt = jnp.einsum("jwo,ijcd->iwcod", eye, wq)                   # (KH, W, Cin, OW, Cout)
    wt = wt.reshape(kh * w_spatial * cin, ow * cout).astype(matmul_dtype)
    cq = jnp.tile(c * qmax, ow).reshape(1, ow * cout).astype(jnp.float32)
    return wt, cq, scale, qmax


def clear_module_forward(
    x_nchw,
    params,
    out_bit_width: int,
    *,
    matmul_dtype=jnp.float32,     # jnp.bfloat16: halves streamed bytes / bf16 MXU (v5e win)
    out_dtype=jnp.float32,        # bf16 halves output HBM bytes if downstream allows it
    nchw_output: bool = False,    # True: PyTorch-layout parity (extra transpose pass)
):
    """Forward pass of ClearModule. Input layout: NCHW. Output: NHWC (default) or NCHW."""
    w = params["w"]
    cout, cin, kh, kw = w.shape
    n, cin_x, h, wd = x_nchw.shape
    assert cin_x == cin, (cin_x, cin)
    oh, ow = h - kh + 1, wd - kw + 1
    wcin = wd * cin
    owcout = ow * cout

    # Input lowering: NCHW -> (N, H, W*Cin).  Tiny (input is the smallest tensor).
    xr = jnp.transpose(x_nchw, (0, 2, 3, 1)).reshape(n, h, wcin).astype(matmul_dtype)
    wt, cq, scale, qmax = _lower_weights(params, wd, out_bit_width, matmul_dtype)

    kernel = functools.partial(
        _conv_bn_quant_kernel, kh=kh, oh=oh, wcin=wcin, qmax=qmax, scale=scale
    )

    out = pl.pallas_call(
        kernel,
        out_shape=jax.ShapeDtypeStruct((n, oh, owcout), out_dtype),
        grid_spec=pltpu.PrefetchScalarGridSpec(
            num_scalar_prefetch=0,
            grid=(n,),  # one image per step; 'parallel' shards across TCs (v7x megacore)
            in_specs=[
                pl.BlockSpec((1, h, wcin), lambda i: (i, 0, 0)),       # one NHWC image
                pl.BlockSpec((kh * wcin, owcout), lambda i: (0, 0)),   # lowered weights (resident)
                pl.BlockSpec((1, owcout), lambda i: (0, 0)),           # fused bias/offset
            ],
            out_specs=pl.BlockSpec((1, oh, owcout), lambda i: (i, 0, 0)),
        ),
        # Blocks are far below the scoped-VMEM default on all generations; raise
        # vmem_limit_bytes here only if spatial dims / Cout are scaled up a lot.
        compiler_params=pltpu.CompilerParams(dimension_semantics=("parallel",)),
    )(xr, wt, cq)

    out = out.reshape(n, oh, ow, cout)                 # NHWC; reshape is layout-free
    if nchw_output:
        out = jnp.transpose(out, (0, 3, 1, 2))         # optional PyTorch-layout pass
    return out


def _reference_forward_nhwc(x_nchw, params, out_bit_width: int):
    """Pure-JAX reference (same math, no Pallas), NHWC output."""
    w, b = params["w"], params["b"]
    a = params["gamma"] / jnp.sqrt(params["rvar"] + BN_EPS)
    c = (b - params["rmean"]) * a + params["beta"]
    y = jax.lax.conv_general_dilated(
        x_nchw, w, window_strides=(1, 1), padding="VALID",
        dimension_numbers=("NCHW", "OIHW", "NCHW"))
    y = y * a[None, :, None, None] + c[None, :, None, None]
    scale, qmax = _quant_params(out_bit_width)
    y = jnp.clip(jnp.round(y / scale), -qmax, qmax) * scale
    return jnp.transpose(y, (0, 2, 3, 1))


if __name__ == "__main__":
    key = jax.random.PRNGKey(0)
    k_param, k_x = jax.random.split(key)

    in_ch = 3
    out_bit_width = 8
    batch, spatial = 2, 16

    params = init_params(k_param, in_ch)
    x = jax.random.normal(k_x, (batch, in_ch, spatial, spatial), jnp.float32)

    scale, _ = _quant_params(out_bit_width)
    out_ch = CNV_OUT_CH_POOL[0][0]
    oh = ow = spatial - KERNEL_SIZE + 1

    # Default path: f32 matmul, NHWC output (no post-kernel transpose pass).
    y = jax.block_until_ready(clear_module_forward(x, params, out_bit_width))
    y_ref = _reference_forward_nhwc(x, params, out_bit_width)
    assert y.shape == (batch, oh, ow, out_ch), y.shape
    max_err = float(jnp.max(jnp.abs(y - y_ref)))
    assert max_err <= scale + 1e-6, f"max_err={max_err}"   # <= one quant step of slack

    # Optional PyTorch-layout output for drop-in parity with the nn.Module.
    y_nchw = jax.block_until_ready(
        clear_module_forward(x, params, out_bit_width, nchw_output=True))
    assert y_nchw.shape == (batch, out_ch, oh, ow), y_nchw.shape
    assert float(jnp.max(jnp.abs(y_nchw - jnp.transpose(y, (0, 3, 1, 2))))) == 0.0

    # bf16 matmul inputs (v5e MXU / HBM-stream optimization); fake-quant absorbs the
    # bf16 rounding — allow a few quantization LSBs of slack.
    y_bf16 = jax.block_until_ready(
        clear_module_forward(x, params, out_bit_width, matmul_dtype=jnp.bfloat16))
    max_err_bf16 = float(jnp.max(jnp.abs(y_bf16 - y_ref)))
    assert max_err_bf16 <= 4 * scale + 1e-6, f"max_err_bf16={max_err_bf16}"

    print("KERNEL_OK")
</pallas_src>

<mosaic_0001>
module attributes {stable_mosaic.version = 11 : i64} {
  func.func @_conv_bn_quant_kernel(%arg0: i32, %arg1: memref<1x16x48xf32, #tpu.memory_space<vmem>>, %arg2: memref<144x896xf32, #tpu.memory_space<vmem>>, %arg3: memref<1x896xf32, #tpu.memory_space<vmem>>, %arg4: memref<1x14x896xf32, #tpu.memory_space<vmem>>) attributes {dimension_semantics = [#tpu.dimension_semantics<parallel>], iteration_bounds = array<i64: 2>, scalar_prefetch = 0 : i64, scratch_operands = 0 : i64, tpu.core_type = #tpu.core_type<tc>, window_params = [{transform_indices = @transform_0, window_bounds = array<i64: 1, 16, 48>}, {pipeline_mode = #tpu.pipeline_mode<synchronous>, transform_indices = @transform_1, window_bounds = array<i64: 144, 896>}, {pipeline_mode = #tpu.pipeline_mode<synchronous>, transform_indices = @transform_2, window_bounds = array<i64: 1, 896>}, {transform_indices = @transform_3, window_bounds = array<i64: 1, 14, 896>}]} {
    %c0 = arith.constant 0 : index
    %c0_0 = arith.constant 0 : index
    %c0_1 = arith.constant 0 : index
    %0 = vector.load %arg1[%c0, %c0_0, %c0_1] : memref<1x16x48xf32, #tpu.memory_space<vmem>>, vector<1x16x48xf32>
    %1 = vector.shape_cast %0 : vector<1x16x48xf32> to vector<16x48xf32>
    %2 = vector.extract_strided_slice %1 {offsets = [0, 0], sizes = [14, 48], strides = [1, 1]} : vector<16x48xf32> to vector<14x48xf32>
    %c0_2 = arith.constant 0 : index
    %c0_3 = arith.constant 0 : index
    %3 = vector.load %arg2[%c0_2, %c0_3] : memref<144x896xf32, #tpu.memory_space<vmem>>, vector<48x896xf32>
    %cst = arith.constant dense<0.000000e+00> : vector<14x896xf32>
    %4 = tpu.matmul %2, %3, %cst {dimension_numbers = #tpu.dot_dimension_numbers<[1], [0], [0], [1], [0, 0, 1, 1], [], []>} : vector<14x48xf32>, vector<48x896xf32>, vector<14x896xf32> -> vector<14x896xf32>
    %5 = vector.extract_strided_slice %1 {offsets = [1, 0], sizes = [14, 48], strides = [1, 1]} : vector<16x48xf32> to vector<14x48xf32>
    %c48 = arith.constant 48 : index
    %c0_4 = arith.constant 0 : index
    %6 = vector.load %arg2[%c48, %c0_4] : memref<144x896xf32, #tpu.memory_space<vmem>>, vector<48x896xf32>
    %cst_5 = arith.constant dense<0.000000e+00> : vector<14x896xf32>
    %7 = tpu.matmul %5, %6, %cst_5 {dimension_numbers = #tpu.dot_dimension_numbers<[1], [0], [0], [1], [0, 0, 1, 1], [], []>} : vector<14x48xf32>, vector<48x896xf32>, vector<14x896xf32> -> vector<14x896xf32>
    %8 = arith.addf %4, %7 : vector<14x896xf32>
    %9 = vector.extract_strided_slice %1 {offsets = [2, 0], sizes = [14, 48], strides = [1, 1]} : vector<16x48xf32> to vector<14x48xf32>
    %c96 = arith.constant 96 : index
    %c0_6 = arith.constant 0 : index
    %10 = vector.load %arg2[%c96, %c0_6] : memref<144x896xf32, #tpu.memory_space<vmem>>, vector<48x896xf32>
    %cst_7 = arith.constant dense<0.000000e+00> : vector<14x896xf32>
    %11 = tpu.matmul %9, %10, %cst_7 {dimension_numbers = #tpu.dot_dimension_numbers<[1], [0], [0], [1], [0, 0, 1, 1], [], []>} : vector<14x48xf32>, vector<48x896xf32>, vector<14x896xf32> -> vector<14x896xf32>
    %12 = arith.addf %8, %11 : vector<14x896xf32>
    %c0_8 = arith.constant 0 : index
    %c0_9 = arith.constant 0 : index
    %13 = vector.load %arg3[%c0_8, %c0_9] : memref<1x896xf32, #tpu.memory_space<vmem>>, vector<1x896xf32>
    %14 = vector.broadcast %13 : vector<1x896xf32> to vector<14x896xf32>
    %15 = arith.addf %12, %14 : vector<14x896xf32>
    %16 = math.roundeven %15 : vector<14x896xf32>
    %cst_10 = arith.constant -1.270000e+02 : f32
    %cst_11 = arith.constant 1.270000e+02 : f32
    %17 = vector.broadcast %cst_10 : f32 to vector<14x896xf32>
    %18 = arith.maximumf %17, %16 : vector<14x896xf32>
    %19 = vector.broadcast %cst_11 : f32 to vector<14x896xf32>
    %20 = arith.minimumf %19, %18 : vector<14x896xf32>
    %cst_12 = arith.constant 0.00787401571 : f32
    %21 = vector.broadcast %cst_12 : f32 to vector<14x896xf32>
    %22 = arith.mulf %20, %21 : vector<14x896xf32>
    %c0_13 = arith.constant 0 : index
    %c0_14 = arith.constant 0 : index
    %c0_15 = arith.constant 0 : index
    %23 = vector.load %arg4[%c0_13, %c0_14, %c0_15] : memref<1x14x896xf32, #tpu.memory_space<vmem>>, vector<1x14x896xf32>
    %24 = vector.shape_cast %23 : vector<1x14x896xf32> to vector<14x896xf32>
    %25 = vector.shape_cast %22 : vector<14x896xf32> to vector<1x14x896xf32>
    tpu.vector_store %arg4[%c0_13, %c0_14, %c0_15], %25 {strides = array<i32>} : memref<1x14x896xf32, #tpu.memory_space<vmem>>, vector<1x14x896xf32>,
    return
  }
  func.func @transform_0(%arg0: i32) -> (i32, i32, i32) {
    %c0_i32 = arith.constant 0 : i32
    %c0_i32_0 = arith.constant 0 : i32
    %c0_i32_1 = arith.constant 0 : i32
    return %arg0, %c0_i32, %c0_i32_0 : i32, i32, i32
  }
  func.func @transform_1(%arg0: i32) -> (i32, i32) {
    %c0_i32 = arith.constant 0 : i32
    %c0_i32_0 = arith.constant 0 : i32
    %c0_i32_1 = arith.constant 0 : i32
    return %c0_i32, %c0_i32_0 : i32, i32
  }
  func.func @transform_2(%arg0: i32) -> (i32, i32) {
    %c0_i32 = arith.constant 0 : i32
    %c0_i32_0 = arith.constant 0 : i32
    %c0_i32_1 = arith.constant 0 : i32
    return %c0_i32, %c0_i32_0 : i32, i32
  }
  func.func @transform_3(%arg0: i32) -> (i32, i32, i32) {
    %c0_i32 = arith.constant 0 : i32
    %c0_i32_0 = arith.constant 0 : i32
    %c0_i32_1 = arith.constant 0 : i32
    return %arg0, %c0_i32, %c0_i32_0 : i32, i32, i32
  }
}

</mosaic_0001>

<bundles_post_ra>
// kernel: tpu_custom_call.1
= control target key start
LH: loop header
LB: loop body
LE: loop exit
PB: predicated region body
PF: predicated region fallthrough
CT: control target
= control target key end

     0   :  { %8 = vsyncpa [#allocation3], 0  ;;  %s2302_s0 = inlined_call_operand.hbm [shape: f32[2,16,48], index: 0, kind: input, shape index: {}]   ;;  %s2303_s1 = inlined_call_operand.hbm [shape: f32[144,896], index: 1, kind: input, shape index: {}]   ;;  %s2304_s2 = inlined_call_operand.hbm [shape: f32[1,896], index: 2, kind: input, shape index: {}]   ;;  %s2305_s3 = inlined_call_operand.vmem [shape: f32[2,14,896], index: 3, kind: output, shape index: {}]  }
   0x1   :  { %10 = vsyncpa [#allocation3 + $0x1], 0 }
   0x2   :  { %11 = vsyncpa [#allocation5], 0  ;;  %s1957_s12 = smov 0   ;;  %s1959_s13 = smov 0  }
   0x3   :  { %s1961_s14 = smov 0   ;;  %s1963_s15 = smov 0  }
   0x4 LB: > { %s1976_s16 = sadd.s32 4294967295, %s1927_s15   ;;  %p37_p0 = scmp.ne.s32.totalorder %s1919_s13, %s1915_s12  ;;  %s1927_s15 = sphi %s1963_s15, %s2340_s15   ;;  %s1923_s14 = sphi %s1961_s14, %s2339_s14   ;;  %s1919_s13 = sphi %s1959_s13, %s2338_s13   ;;  %s1915_s12 = sphi %s1957_s12, %s2337_s12  }
   0x5   : > { %p2306_p1 = scmp.eq.s32.totalorder %s1976_s16, 0  ;;  %p1509_p2 = scmp.ge.s32.totalorder %s1927_s15, 1 }
   0x6   : > { %p116_p3 = scmp.lt.s32.totalorder %s1927_s15, 3  ;;  %s1929_s19 = smov [#allocation4]  }
   0x7   : > { %p1984_p4 = por %p2306_p1, %p37_p0  ;;  %s128_s20 = sshll.u32 %s1929_s19, 4  ;;  %s129_s20 = int_to_ptr.vmem [resolvable:$true] %s128_s20 }
   0x8   : > { %p1988_p5 = pnand %p1509_p2, %p116_p3  ;;  %s1930_s22 = smov [#allocation6]  }
   0x9   : > { %s2309_s17 = scalar_select %p1984_p4, 1, 0 }
   0xa   : > { %s2310_s18 = scalar_select %p1988_p5, 1, 0 }
   0xb   : > { %p1754_p6 = pneg %p1988_p5  ;;  %s142_s23 = sshll.u32 %s1930_s22, 4  ;;  %s143_s23 = int_to_ptr.vmem [resolvable:$true] %s142_s23 }
   0xc   : > { %s1820_s24 = scalar_lea.vmem %s129_s20, 16128  ;;  %p1828_p12 = scmp.lt.s32.totalorder %s129_s20, %s129_s20 }
   0xd   : > { %p1996_p7 = pnand %p1754_p6, %p2306_p1  ;;  %p1821_p9 = scmp.ne.s32.totalorder %s129_s20, %s1820_s24 }
   0xe   : > { %p1829_p13 = scmp.lt.s32.totalorder %s1820_s24, %s1820_s24 }
   0xf   : > { %p1811_p8 = pneg %p1996_p7 }
  0x10   : > { %p1830_p0 = por %p1829_p13, %p1828_p12 }
  0x11   : > { %p1823_p10 = pnand %p1821_p9, %p1811_p8 }
  0x13   : > { %p1824_p11 = pneg %p1823_p10 }
  0x15   : > { %p1831_p2 = pnand %p1830_p0, %p1824_p11 }
  0x17   : > { %1834 = shalt.err (!%p1831_p2)
}
  0x18   : > { %s1931_s25 = smov 896   ;;  %s1932_s26 = smov 56  }
  0x19   : > { %1757 = dma.hbm_to_vmem [thread:$0]  (!%p1996_p7), %s2303_s1, 16128, %s129_s20, [#allocation5], %s1931_s25, %s1931_s25, %s1932_s26  }
  0x1a   : > { %s1846_s29 = scalar_lea.vmem %s143_s23, 112  ;;  %s1853_s30 = scalar_lea.vmem %s143_s23, 128 }
  0x1b   : > { %p1847_p3 = scmp.ne.s32.totalorder %s143_s23, %s1846_s29  ;;  %p1854_p10 = scmp.lt.s32.totalorder %s143_s23, %s143_s23 }
  0x1c   : > { %p1855_p12 = scmp.lt.s32.totalorder %s1853_s30, %s1846_s29 }
  0x1d   : > { %p1849_p6 = pnand %p1847_p3, %p1811_p8 }
  0x1e   : > { %p1856_p11 = por %p1855_p12, %p1854_p10 }
  0x1f   : > { %p1850_p9 = pneg %p1849_p6 }
  0x21   : > { %p1857_p13 = pnand %p1856_p11, %p1850_p9 }
  0x23   : > { %1860 = shalt.err (!%p1857_p13)
}
  0x24   : > { %1760 = dma.hbm_to_vmem [thread:$0]  (!%p1996_p7), %s2304_s2, 112, %s143_s23, [#allocation5]  }
  0x25   : > { %s2019_s6 = sadd.s32 1, %s1927_s15   ;;  %s24_s7 = sadd.s32 1, %s1923_s14 }
  0x26   : > { %s21_s8 = ssub.s32 %s1927_s15, %s2019_s6  ;;  %p31_p8 = scmp.ne.s32.totalorder %s1923_s14, %s1919_s13 }
  0x27   : > { %p22_p0 = scmp.eq.s32.totalorder %s21_s8, 0  ;;  %p32_p2 = scmp.eq.s32.totalorder %s1927_s15, 0 }
  0x28   : > { %p1767_p3 = scmp.lt.s32.totalorder %s1927_s15, 2  ;;  %s153_s9 = sand.u32 1, %s1923_s14  }
  0x29   : > { %s2030_s10 = scalar_select %p22_p0, %s1923_s14, %s24_s7  }
  0x2a   : > { %p33_p6 = por %p32_p2, %p31_p8  ;;  %s1513_s11 = sshll.u32 %s153_s9, 4 }
  0x2b   : > { %s1561_s12 = sshll.u32 %s1927_s15, 8  ;;  %s157_s22 = scalar_lea.vmem [#allocation2], %s1513_s11 }
  0x2c   : > { %s2036_s21 = scalar_lea.hbm %s2302_s0, %s1561_s12  ;;  %s164_s23 = sshll.u32 %s157_s22, 4  ;;  %s2042_s23 = int_to_ptr.vmem [resolvable:$true] %s164_s23 }
  0x2d   : > { %p2038_p7 = pnand %p1767_p3, %p33_p6  ;;  %s2044_s25 = scalar_lea.sflag [#allocation3], %s153_s9 }
  0x2e   : > { %s1861_s15 = scalar_lea.hbm %s2036_s21, 256  ;;  %s1866_s28 = scalar_lea.hbm %s2302_s0, 512 }
  0x2f   : > { %p1862_p9 = scmp.ne.s32.totalorder %s2036_s21, %s1861_s15  ;;  %p1863_p10 = pneg %p2038_p7 }
  0x30   : > { %p1867_p13 = scmp.lt.s32.totalorder %s2036_s21, %s2302_s0  ;;  %p1868_p8 = scmp.lt.s32.totalorder %s1866_s28, %s1861_s15 }
  0x31   : > { %p1864_p12 = pnand %p1863_p10, %p1862_p9 }
  0x32   : > { %p1869_p0 = por %p1868_p8, %p1867_p13 }
  0x33   : > { %p1865_p11 = pneg %p1864_p12 }
  0x35   : > { %p1870_p2 = pnand %p1869_p0, %p1865_p11 }
  0x37   : > { %1873 = shalt.err (!%p1870_p2)
}
  0x38   : > { %s1874_s4 = scalar_lea.vmem %s2042_s23, 256  ;;  %s1933_s5 = smov [#allocation2]  }
  0x39   : > { %p1875_p3 = scmp.ne.s32.totalorder %s2042_s23, %s1874_s4  ;;  %s1879_s7 = sshll.u32 %s1933_s5, 4  ;;  %s1880_s7 = int_to_ptr.vmem [resolvable:$false] %s1879_s7 }
  0x3a   : > { %s1881_s8 = scalar_lea.vmem %s1880_s7, 512  ;;  %p1882_p12 = scmp.lt.s32.totalorder %s2042_s23, %s1880_s7 }
  0x3b   : > { %p1877_p6 = pnand %p1875_p3, %p1863_p10  ;;  %p1883_p1 = scmp.lt.s32.totalorder %s1881_s8, %s1874_s4 }
  0x3d   : > { %p1878_p9 = pneg %p1877_p6  ;;  %p1884_p4 = por %p1883_p1, %p1882_p12 }
  0x3f   : > { %p1885_p5 = pnand %p1884_p4, %p1878_p9 }
  0x41   : > { %1888 = shalt.err (!%p1885_p5)
}
  0x42   : > { %s1934_s9 = smov 128   ;;  %s1935_s11 = smov 8  }
  0x43   : > { %1764 = dma.hbm_to_vmem [thread:$0]  (!%p2038_p7), %s2036_s21, 256, %s2042_s23, %s2044_s25, %s1934_s9, %s1934_s9, %s1935_s11  }
  0x44   : > { %p2313_p10 = scmp.ne.s32.totalorder %s2310_s18, 0 }
  0x45   : > { %s178_s12 = sand.u32 (!%p2313_p10), 1, %s1919_s13   ;;  %p2314_p1 = scmp.ne.s32.totalorder (!%p2313_p10), %s2309_s17, 0 }
  0x46   : > { %176 = sbr.rel (%p2313_p10) target bundleno = 399 (0x18f), region = 32  ;;  %s2068_s19 = sshll.u32 (!%p2313_p10), %s178_s12, 4 }
  0x47   : > { %s179_s20 = scalar_lea.sflag (!%p2313_p10), [#allocation3], %s178_s12  ;;  %s182_s22 = scalar_lea.vmem (!%p2313_p10), [#allocation2], %s2068_s19 }
  0x4b   : > { %1906 = dma.done.wait (%p2314_p1), %s179_s20, 256  }
  0x4c   : > { %1908 = vsyncadd (%p2314_p1), %s179_s20, 4294967040  ;;  %p2315_p4 = scmp.eq.s32.totalorder %s1976_s16, 0 }
  0x4e   : > { %1910 = dma.done.wait (%p2315_p4), [#allocation5], 16240   ;;  %p2316_p5 = pmov %p2315_p4 }
  0x4f   : > { %v1936_v0 = vmov 0.0   ;;  %v298_v1 = vld [vmem:[#allocation4 + $0x270] sm:$0xff]  ;;  %v300_v2 = vld [vmem:[#allocation4 + $0x280] sm:$0xff]  ;;  %v297_v3 = vld [vmem:[#allocation4 + $0x268] sm:$0xff]  ;;  %vm306_vm0 = vcmask 1046528   ;;  %vm310_vm1 = vcmask 392192  }
  0x50   : > { %1912 = vsyncadd (%p2316_p5), [#allocation5], 4294951056  ;;  %379 = vmatprep.mubr.f32.mxu0 %v1936_v0  ;;  %456 = vmatprep.mubr.f32.mxu1 %v1936_v0  ;;  %v299_v4 = vld [vmem:[#allocation4 + $0x278] sm:$0xff]  ;;  %v293_v6 = vld [vmem:[#allocation4 + $0x248] sm:$0xff]  ;;  %vm973_vm2 = vcmask 1045504   ;;  %p213_p7 = scmp.lt.s32.totalorder %s1976_s16, 1 }
  0x51   : > { %335 = vmatprep.subr.mxu0 %v298_v1  ;;  %412 = vmatprep.subr.mxu1 %v300_v2  ;;  %v291_v5 = vld [vmem:[#allocation4 + $0x238] sm:$0xff]  ;;  %v290_v7 = vld [vmem:[#allocation4 + $0x230] sm:$0xff]  ;;  %v292_v8 = vld [vmem:[#allocation4 + $0x240] sm:$0xff] }
  0x52   : > { %336 = vmatpush1.msra.mxu0 %v297_v3  ;;  %413 = vmatpush1.msra.mxu1 %v299_v4  ;;  %v284_v9 = vld [vmem:[#allocation4 + $0x200] sm:$0xff]  ;;  %v286_v10 = vld [vmem:[#allocation4 + $0x210] sm:$0xff]  ;;  %v283_v11 = vld [vmem:[#allocation4 + $0x1f8] sm:$0xff]  ;;  %s2342_s16 = smov (!%p213_p7, %s1976_s16), 1 }
  0x53   : > { %337 = vmatprep.subr.mxu0 %v291_v5  ;;  %414 = vmatprep.subr.mxu1 %v293_v6  ;;  %v285_v12 = vld [vmem:[#allocation4 + $0x208] sm:$0xff]  ;;  %v279_v14 = vld [vmem:[#allocation4 + $0x1d8] sm:$0xff]  ;;  %v276_v15 = vld [vmem:[#allocation4 + $0x1c0] sm:$0xff]  ;;  %s1631_s17 = smul.u32 112, %s2342_s16 }
  0x54   : > { %338 = vmatpush1.msra.mxu0 %v290_v7  ;;  %415 = vmatpush1.msra.mxu1 %v292_v8  ;;  %v277_v13 = vld [vmem:[#allocation4 + $0x1c8] sm:$0xff]  ;;  %v278_v16 = vld [vmem:[#allocation4 + $0x1d0] sm:$0xff]  ;;  %v272_v18 = vld [vmem:[#allocation4 + $0x1a0] sm:$0xff] }
  0x55   : > { %339 = vmatprep.subr.mxu0 %v284_v9  ;;  %416 = vmatprep.subr.mxu1 %v286_v10  ;;  %v270_v17 = vld [vmem:[#allocation4 + $0x190] sm:$0xff]  ;;  %v269_v19 = vld [vmem:[#allocation4 + $0x188] sm:$0xff]  ;;  %v271_v20 = vld [vmem:[#allocation4 + $0x198] sm:$0xff]  ;;  %s2217_s21 = scalar_lea.vmem %s2305_s3, %s1631_s17 }
  0x56   : > { %340 = vmatpush1.msra.mxu0 %v283_v11  ;;  %417 = vmatpush1.msra.mxu1 %v285_v12  ;;  %v263_v21 = vld [vmem:[#allocation4 + $0x158] sm:$0xff]  ;;  %v265_v22 = vld [vmem:[#allocation4 + $0x168] sm:$0xff]  ;;  %v2083_v23 = vld [vmem:[%s182_s22] sm:$0xff] }
  0x57   : > { %341 = vmatprep.subr.mxu0 %v277_v13  ;;  %418 = vmatprep.subr.mxu1 %v279_v14  ;;  %v2087_v24 = vld [vmem:[%s182_s22 + $0x8] sm:$0xff]  ;;  %v262_v25 = vld [vmem:[#allocation4 + $0x150] sm:$0xff]  ;;  %v264_v26 = vld [vmem:[#allocation4 + $0x160] sm:$0xff]  ;;  %v307_v27 = vrot.slane %v2083_v23, 1 }
  0x58   : > { %342 = vmatpush1.msra.mxu0 %v276_v15  ;;  %419 = vmatpush1.msra.mxu1 %v278_v16  ;;  %v2091_v28 = vrot.slane %v2087_v24, 1  ;;  %v302_v29 = vld [vmem:[#allocation4 + $0x290] sm:$0xff]  ;;  %v303_v31 = vld [vmem:[#allocation4 + $0x298] sm:$0xff]  ;;  %v301_v32 = vld [vmem:[#allocation4 + $0x288] sm:$0xff] }
  0x59   : > { %343 = vmatprep.subr.mxu0 %v270_v17  ;;  %420 = vmatprep.subr.mxu1 %v272_v18  ;;  %v295_v33 = vld [vmem:[#allocation4 + $0x258] sm:$0xff]  ;;  %v296_v34 = vld [vmem:[#allocation4 + $0x260] sm:$0xff]  ;;  %v294_v35 = vld [vmem:[#allocation4 + $0x250] sm:$0xff] }
  0x5a   : > { %344 = vmatpush1.msra.mxu0 %v269_v19  ;;  %421 = vmatpush1.msra.mxu1 %v271_v20  ;;  %v309_v30 = vsel %vm306_vm0, %v307_v27, %v2091_v28  ;;  %v288_v36 = vld [vmem:[#allocation4 + $0x220] sm:$0xff]  ;;  %v289_v37 = vld [vmem:[#allocation4 + $0x228] sm:$0xff]  ;;  %v287_v38 = vld [vmem:[#allocation4 + $0x218] sm:$0xff] }
  0x5b   : > { %345 = vmatprep.subr.mxu0 %v263_v21  ;;  %422 = vmatprep.subr.mxu1 %v265_v22  ;;  %v281_v39 = vld [vmem:[#allocation4 + $0x1e8] sm:$0xff]  ;;  %v282_v40 = vld [vmem:[#allocation4 + $0x1f0] sm:$0xff]  ;;  %v280_v41 = vld [vmem:[#allocation4 + $0x1e0] sm:$0xff] }
  0x5c   : > { %346 = vmatpush1.msra.mxu0 %v262_v25  ;;  %423 = vmatpush1.msra.mxu1 %v264_v26  ;;  %v274_v42 = vld [vmem:[#allocation4 + $0x1b0] sm:$0xff]  ;;  %v275_v43 = vld [vmem:[#allocation4 + $0x1b8] sm:$0xff]  ;;  %v273_v44 = vld [vmem:[#allocation4 + $0x1a8] sm:$0xff] }
  0x5d   : > { %1521 = vmatmul.mubr.msk.f32.vlgmr.msra.gmra.mxu0 %vm310_vm1, %v309_v30  ;;  %489 = vmatprep.subr.mxu0 %v302_v29  ;;  %v267_v45 = vld [vmem:[#allocation4 + $0x178] sm:$0xff]  ;;  %v268_v46 = vld [vmem:[#allocation4 + $0x180] sm:$0xff]  ;;  %v266_v47 = vld [vmem:[#allocation4 + $0x170] sm:$0xff] }
  0x5e   : > { %1586 = vmatprep.subr.mxu1 %v303_v31  ;;  %1523 = vmatmul.mubr.msk.f32.vlgmr.msra.gmra.mxu1 %vm310_vm1, %v309_v30  ;;  %v256_v48 = vld [vmem:[#allocation4 + $0x120] sm:$0xff]  ;;  %v258_v49 = vld [vmem:[#allocation4 + $0x130] sm:$0xff]  ;;  %v255_v50 = vld [vmem:[#allocation4 + $0x118] sm:$0xff] }
  0x5f   : > { %490 = vmatpush1.msra.mxu0 %v301_v32  ;;  %1587 = vmatpush3.msra.mxu1 %v303_v31  ;;  %v257_v51 = vld [vmem:[#allocation4 + $0x128] sm:$0xff]  ;;  %v251_v53 = vld [vmem:[#allocation4 + $0xf8] sm:$0xff]  ;;  %v248_v54 = vld [vmem:[#allocation4 + $0xe0] sm:$0xff] }
  0x60   : > { %491 = vmatprep.subr.mxu0 %v295_v33  ;;  %1588 = vmatprep.subr.mxu1 %v296_v34  ;;  %v249_v52 = vld [vmem:[#allocation4 + $0xe8] sm:$0xff]  ;;  %v250_v55 = vld [vmem:[#allocation4 + $0xf0] sm:$0xff]  ;;  %v244_v57 = vld [vmem:[#allocation4 + $0xc0] sm:$0xff] }
  0x61   : > { %492 = vmatpush1.msra.mxu0 %v294_v35  ;;  %1589 = vmatpush3.msra.mxu1 %v296_v34  ;;  %v242_v56 = vld [vmem:[#allocation4 + $0xb0] sm:$0xff]  ;;  %v241_v58 = vld [vmem:[#allocation4 + $0xa8] sm:$0xff]  ;;  %v243_v59 = vld [vmem:[#allocation4 + $0xb8] sm:$0xff] }
  0x62   : > { %493 = vmatprep.subr.mxu0 %v288_v36  ;;  %1590 = vmatprep.subr.mxu1 %v289_v37  ;;  %v235_v60 = vld [vmem:[#allocation4 + $0x78] sm:$0xff]  ;;  %v237_v61 = vld [vmem:[#allocation4 + $0x88] sm:$0xff]  ;;  %v234_v62 = vld [vmem:[#allocation4 + $0x70] sm:$0xff] }
  0x63   : > { %494 = vmatpush1.msra.mxu0 %v287_v38  ;;  %1591 = vmatpush3.msra.mxu1 %v289_v37  ;;  %v236_v63 = vld [vmem:[#allocation4 + $0x80] sm:$0xff]  ;;  %v230_v2 = vld [vmem:[#allocation4 + $0x50] sm:$0xff]  ;;  %v227_v3 = vld [vmem:[#allocation4 + $0x38] sm:$0xff] }
  0x64   : > { %385 = vmatprep.mubr.f32.mxu0 %v1936_v0  ;;  %495 = vmatprep.subr.mxu0 %v281_v39  ;;  %v228_v1 = vld [vmem:[#allocation4 + $0x40] sm:$0xff]  ;;  %v229_v4 = vld [vmem:[#allocation4 + $0x48] sm:$0xff]  ;;  %v223_v6 = vld [vmem:[#allocation4 + $0x18] sm:$0xff] }
  0x65   : > { %1592 = vmatprep.subr.mxu1 %v282_v40  ;;  %1522 = vmatmul.mubr.msk.f32.gmra.mxu0 %vm310_vm1, %v2091_v28  ;;  %v221_v5 = vld [vmem:[#allocation4 + $0x8] sm:$0xff]  ;;  %v220_v7 = vld [vmem:[#allocation4] sm:$0xff]  ;;  %v222_v8 = vld [vmem:[#allocation4 + $0x10] sm:$0xff] }
  0x66   : > { %496 = vmatpush1.msra.mxu0 %v280_v41  ;;  %1593 = vmatpush3.msra.mxu1 %v282_v40  ;;  %v260_v9 = vld [vmem:[#allocation4 + $0x140] sm:$0xff]  ;;  %v261_v10 = vld [vmem:[#allocation4 + $0x148] sm:$0xff]  ;;  %v259_v11 = vld [vmem:[#allocation4 + $0x138] sm:$0xff] }
  0x67   : > { %462 = vmatprep.mubr.f32.mxu1 %v1936_v0  ;;  %497 = vmatprep.subr.mxu0 %v274_v42  ;;  %v253_v12 = vld [vmem:[#allocation4 + $0x108] sm:$0xff]  ;;  %v254_v13 = vld [vmem:[#allocation4 + $0x110] sm:$0xff]  ;;  %v252_v14 = vld [vmem:[#allocation4 + $0x100] sm:$0xff] }
  0x68   : > { %1594 = vmatprep.subr.mxu1 %v275_v43  ;;  %1524 = vmatmul.mubr.msk.f32.gmra.mxu1 %vm310_vm1, %v2091_v28  ;;  %v246_v15 = vld [vmem:[#allocation4 + $0xd0] sm:$0xff]  ;;  %v247_v16 = vld [vmem:[#allocation4 + $0xd8] sm:$0xff]  ;;  %v245_v17 = vld [vmem:[#allocation4 + $0xc8] sm:$0xff] }
  0x69   : > { %498 = vmatpush1.msra.mxu0 %v273_v44  ;;  %1595 = vmatpush3.msra.mxu1 %v275_v43  ;;  %v239_v18 = vld [vmem:[#allocation4 + $0x98] sm:$0xff]  ;;  %v240_v19 = vld [vmem:[#allocation4 + $0xa0] sm:$0xff]  ;;  %v238_v20 = vld [vmem:[#allocation4 + $0x90] sm:$0xff] }
  0x6a   : > { %499 = vmatprep.subr.mxu0 %v267_v45  ;;  %1596 = vmatprep.subr.mxu1 %v268_v46  ;;  %v232_v21 = vld [vmem:[#allocation4 + $0x60] sm:$0xff]  ;;  %v233_v22 = vld [vmem:[#allocation4 + $0x68] sm:$0xff]  ;;  %v231_v25 = vld [vmem:[#allocation4 + $0x58] sm:$0xff] }
  0x6b   : > { %500 = vmatpush1.msra.mxu0 %v266_v47  ;;  %533 = vmatprep.mubr.f32.mxu0 %v1936_v0  ;;  %v225_v26 = vld [vmem:[#allocation4 + $0x28] sm:$0xff]  ;;  %v226_v27 = vld [vmem:[#allocation4 + $0x30] sm:$0xff]  ;;  %v967_v29 = vld [vmem:[#allocation4 + $0x3c0] sm:$0xff] }
  0x6c   : > { %1597 = vmatpush3.msra.mxu1 %v268_v46  ;;  %1525 = vmatmul.mubr.msk.f32.vlgmr.msra.gmra.mxu0 %vm310_vm1, %v309_v30  ;;  %v966_v31 = vld [vmem:[#allocation4 + $0x3b8] sm:$0xff]  ;;  %v968_v32 = vld [vmem:[#allocation4 + $0x3c8] sm:$0xff]  ;;  %v959_v35 = vld [vmem:[#allocation4 + $0x380] sm:$0xff] }
  0x6d   : > { %1598 = vmatprep.mubr.msk.f32.mxu1 %vm310_vm1, %v309_v30  ;;  %645 = vmatprep.subr.mxu0 %v256_v48  ;;  %v969_v30 = vld [vmem:[#allocation4 + $0x3d0] sm:$0xff]  ;;  %v960_v33 = vld [vmem:[#allocation4 + $0x388] sm:$0xff]  ;;  %v962_v34 = vld [vmem:[#allocation4 + $0x398] sm:$0xff] }
  0x6e   : > { %722 = vmatprep.subr.mxu1 %v258_v49  ;;  %1599 = vmatmul.mubr.msk.f32.vlgmr.msra.gmra.mxu1 %vm310_vm1, %v2091_v28  ;;  %v961_v36 = vld [vmem:[#allocation4 + $0x390] sm:$0xff]  ;;  %v955_v38 = vld [vmem:[#allocation4 + $0x360] sm:$0xff]  ;;  %v952_v39 = vld [vmem:[#allocation4 + $0x348] sm:$0xff]  ;;  %v974_v49 = vrot.slane %v2083_v23, 2 }
  0x6f   : > { %646 = vmatpush1.msra.mxu0 %v255_v50  ;;  %723 = vmatpush1.msra.mxu1 %v257_v51  ;;  %v953_v37 = vld [vmem:[#allocation4 + $0x350] sm:$0xff]  ;;  %v954_v40 = vld [vmem:[#allocation4 + $0x358] sm:$0xff]  ;;  %v948_v42 = vld [vmem:[#allocation4 + $0x328] sm:$0xff]  ;;  %v2134_v50 = vrot.slane %v2087_v24, 2 }
  0x70   : > { %647 = vmatprep.subr.mxu0 %v249_v52  ;;  %724 = vmatprep.subr.mxu1 %v251_v53  ;;  %v946_v41 = vld [vmem:[#allocation4 + $0x318] sm:$0xff]  ;;  %v945_v43 = vld [vmem:[#allocation4 + $0x310] sm:$0xff]  ;;  %v947_v44 = vld [vmem:[#allocation4 + $0x320] sm:$0xff] }
  0x71   : > { %648 = vmatpush1.msra.mxu0 %v248_v54  ;;  %725 = vmatpush1.msra.mxu1 %v250_v55  ;;  %v939_v45 = vld [vmem:[#allocation4 + $0x2e0] sm:$0xff]  ;;  %v941_v46 = vld [vmem:[#allocation4 + $0x2f0] sm:$0xff]  ;;  %v938_v47 = vld [vmem:[#allocation4 + $0x2d8] sm:$0xff]  ;;  %v976_v55 = vsel %vm973_vm2, %v974_v49, %v2134_v50 }
  0x72   : > { %649 = vmatprep.subr.mxu0 %v242_v56  ;;  %726 = vmatprep.subr.mxu1 %v244_v57  ;;  %v940_v48 = vld [vmem:[#allocation4 + $0x2e8] sm:$0xff]  ;;  %v934_v52 = vld [vmem:[#allocation4 + $0x2b8] sm:$0xff]  ;;  %v931_v53 = vld [vmem:[#allocation4 + $0x2a0] sm:$0xff] }
  0x73   : > { %650 = vmatpush1.msra.mxu0 %v241_v58  ;;  %727 = vmatpush1.msra.mxu1 %v243_v59  ;;  %v932_v51 = vld [vmem:[#allocation4 + $0x2a8] sm:$0xff]  ;;  %v933_v54 = vld [vmem:[#allocation4 + $0x2b0] sm:$0xff]  ;;  %v970_v56 = vld [vmem:[#allocation4 + $0x3d8] sm:$0xff] }
  0x74   : > { %539 = vmatprep.mubr.f32.mxu0 %v1936_v0  ;;  %651 = vmatprep.subr.mxu0 %v235_v60  ;;  %v964_v57 = vld [vmem:[#allocation4 + $0x3a8] sm:$0xff]  ;;  %v965_v58 = vld [vmem:[#allocation4 + $0x3b0] sm:$0xff]  ;;  %v963_v59 = vld [vmem:[#allocation4 + $0x3a0] sm:$0xff] }
  0x75   : > { %728 = vmatprep.subr.mxu1 %v237_v61  ;;  %1526 = vmatmul.mubr.msk.f32.gmra.mxu0 %vm310_vm1, %v2091_v28  ;;  %v224_v28 = vld [vmem:[#allocation4 + $0x20] sm:$0xff]  ;;  %v957_v60 = vld [vmem:[#allocation4 + $0x370] sm:$0xff]  ;;  %v958_v61 = vld [vmem:[#allocation4 + $0x378] sm:$0xff] }
  0x76   : > { %652 = vmatpush1.msra.mxu0 %v234_v62  ;;  %729 = vmatpush1.msra.mxu1 %v236_v63  ;;  %v956_v62 = vld [vmem:[#allocation4 + $0x368] sm:$0xff]  ;;  %v950_v63 = vld [vmem:[#allocation4 + $0x338] sm:$0xff] }
  0x77   : > { %653 = vmatprep.subr.mxu0 %v228_v1  ;;  %730 = vmatprep.subr.mxu1 %v230_v2  ;;  %v951_v1 = vld [vmem:[#allocation4 + $0x340] sm:$0xff]  ;;  %v949_v2 = vld [vmem:[#allocation4 + $0x330] sm:$0xff] }
  0x78   : > { %654 = vmatpush1.msra.mxu0 %v227_v3  ;;  %731 = vmatpush1.msra.mxu1 %v229_v4  ;;  %v943_v3 = vld [vmem:[#allocation4 + $0x300] sm:$0xff]  ;;  %v944_v4 = vld [vmem:[#allocation4 + $0x308] sm:$0xff] }
  0x79   : > { %655 = vmatprep.subr.mxu0 %v221_v5  ;;  %732 = vmatprep.subr.mxu1 %v223_v6  ;;  %v942_v5 = vld [vmem:[#allocation4 + $0x2f8] sm:$0xff]  ;;  %v936_v6 = vld [vmem:[#allocation4 + $0x2c8] sm:$0xff] }
  0x7a   : > { %656 = vmatpush1.msra.mxu0 %v220_v7  ;;  %689 = vmatprep.mubr.f32.mxu0 %v1936_v0  ;;  %v937_v7 = vld [vmem:[#allocation4 + $0x2d0] sm:$0xff] }
  0x7b   : > { %733 = vmatpush1.msra.mxu1 %v222_v8  ;;  %766 = vmatprep.mubr.f32.mxu1 %v1936_v0  ;;  %v935_v8 = vld [vmem:[#allocation4 + $0x2c0] sm:$0xff] }
  0x7c   : > { %1529 = vmatmul.mubr.msk.f32.vlgmr.msra.gmra.mxu0 %vm310_vm1, %v2083_v23  ;;  %1531 = vmatmul.mubr.msk.f32.vlgmr.msra.gmra.mxu1 %vm310_vm1, %v2083_v23 }
  0x7d   : > { %799 = vmatprep.subr.mxu0 %v260_v9  ;;  %1601 = vmatprep.subr.mxu1 %v261_v10 }
  0x7e   : > { %800 = vmatpush1.msra.mxu0 %v259_v11  ;;  %1602 = vmatpush3.msra.mxu1 %v261_v10 }
  0x7f   : > { %801 = vmatprep.subr.mxu0 %v253_v12  ;;  %1603 = vmatprep.subr.mxu1 %v254_v13 }
  0x80   : > { %695 = vmatprep.mubr.f32.mxu0 %v1936_v0  ;;  %772 = vmatprep.mubr.f32.mxu1 %v1936_v0 }
  0x81   : > { %802 = vmatpush1.msra.mxu0 %v252_v14  ;;  %1604 = vmatpush3.msra.mxu1 %v254_v13 }
  0x82   : > { %1530 = vmatmul.mubr.msk.f32.gmra.mxu0 %vm310_vm1, %v2087_v24  ;;  %1532 = vmatmul.mubr.msk.f32.gmra.mxu1 %vm310_vm1, %v2087_v24 }
  0x83   : > { %803 = vmatprep.subr.mxu0 %v246_v15  ;;  %1605 = vmatprep.subr.mxu1 %v247_v16 }
  0x84   : > { %804 = vmatpush1.msra.mxu0 %v245_v17  ;;  %1606 = vmatpush3.msra.mxu1 %v247_v16 }
  0x85   : > { %805 = vmatprep.subr.mxu0 %v239_v18  ;;  %1607 = vmatprep.subr.mxu1 %v240_v19 }
  0x86   : > { %806 = vmatpush1.msra.mxu0 %v238_v20  ;;  %1608 = vmatpush3.msra.mxu1 %v240_v19 }
  0x87   : > { %807 = vmatprep.subr.mxu0 %v232_v21  ;;  %1609 = vmatprep.subr.mxu1 %v233_v22 }
  0x88   : > { %808 = vmatpush1.msra.mxu0 %v231_v25  ;;  %1610 = vmatpush3.msra.mxu1 %v233_v22 }
  0x89   : > { %809 = vmatprep.subr.mxu0 %v225_v26  ;;  %1611 = vmatprep.subr.mxu1 %v226_v27 }
  0x8a   : > { %810 = vmatpush1.msra.mxu0 %v224_v28  ;;  %843 = vmatprep.mubr.f32.mxu0 %v1936_v0 }
  0x8b   : > { %1612 = vmatpush3.msra.mxu1 %v226_v27  ;;  %1613 = vmatprep.mubr.msk.f32.mxu1 %vm310_vm1, %v2083_v23 }
  0x8c   : > { %1533 = vmatmul.mubr.msk.f32.vlgmr.msra.gmra.mxu0 %vm310_vm1, %v2083_v23  ;;  %1614 = vmatmul.mubr.msk.f32.vlgmr.msra.gmra.mxu1 %vm310_vm1, %v2087_v24  ;;  %v971_v23 = vld [vmem:[#allocation4 + $0x3e0] sm:$0xff] }
  0x8d   : > { %1001 = vmatprep.subr.mxu0 %v967_v29  ;;  %1078 = vmatprep.subr.mxu1 %v969_v30 }
  0x8e   : > { %1002 = vmatpush1.msra.mxu0 %v966_v31  ;;  %1079 = vmatpush1.msra.mxu1 %v968_v32  ;;  %v1303_v31 = vlaneseq }
  0x8f   : > { %1003 = vmatprep.subr.mxu0 %v960_v33  ;;  %1080 = vmatprep.subr.mxu1 %v962_v34 }
  0x90   : > { %849 = vmatprep.mubr.f32.mxu0 %v1936_v0  ;;  %1004 = vmatpush1.msra.mxu0 %v959_v35  ;;  %v1304_v34 = vshrl.u32 %v1303_v31, 7 }
  0x91   : > { %1081 = vmatpush1.msra.mxu1 %v961_v36  ;;  %1534 = vmatmul.mubr.msk.f32.gmra.mxu0 %vm310_vm1, %v2087_v24  ;;  %v972_v24 = vld [vmem:[#allocation4 + $0x3e8] sm:$0xff] }
  0x92   : > { %1005 = vmatprep.subr.mxu0 %v953_v37  ;;  %1082 = vmatprep.subr.mxu1 %v955_v38  ;;  %v1305_v38 = vsub.s32 0, %v1304_v34 }
  0x93   : > { %1006 = vmatpush1.msra.mxu0 %v952_v39  ;;  %1083 = vmatpush1.msra.mxu1 %v954_v40  ;;  %v1313_v39 = vsub.s32 2, %v1304_v34  ;;  %v1301_v40 = vld [vmem:[#allocation6] sm:$0xff] }
  0x94   : > { %1007 = vmatprep.subr.mxu0 %v946_v41  ;;  %1084 = vmatprep.subr.mxu1 %v948_v42  ;;  %v1309_v41 = vsub.s32 1, %v1304_v34  ;;  %v1317_v42 = vsub.s32 3, %v1304_v34 }
  0x95   : > { %1008 = vmatpush1.msra.mxu0 %v945_v43  ;;  %1085 = vmatpush1.msra.mxu1 %v947_v44  ;;  %v1321_v43 = vsub.s32 4, %v1304_v34  ;;  %v1329_v44 = vsub.s32 6, %v1304_v34  ;;  %v2155_v49 = vrot.slane %v1301_v40, %v1313_v39 }
  0x96   : > { %1009 = vmatprep.subr.mxu0 %v939_v45  ;;  %1086 = vmatprep.subr.mxu1 %v941_v46  ;;  %v1325_v45 = vsub.s32 5, %v1304_v34 }
  0x97   : > { %1010 = vmatpush1.msra.mxu0 %v938_v47  ;;  %1087 = vmatpush1.msra.mxu1 %v940_v48  ;;  %v1306_v48 = vrot.slane %v1301_v40, %v1305_v38 }
  0x98   : > { %1011 = vmatprep.subr.mxu0 %v932_v51  ;;  %1088 = vmatprep.subr.mxu1 %v934_v52  ;;  %v2157_v52 = vrot.slane %v1301_v40, %v1309_v41 }
  0x99   : > { %1012 = vmatpush1.msra.mxu0 %v931_v53  ;;  %1045 = vmatprep.mubr.f32.mxu0 %v1936_v0  ;;  %v2159_v53 = vrot.slane %v1301_v40, %v1317_v42 }
  0x9a   : > { %1089 = vmatpush1.msra.mxu1 %v933_v54  ;;  %1122 = vmatprep.mubr.f32.mxu1 %v1936_v0 }
  0x9b   : > { %1537 = vmatmul.mubr.msk.f32.vlgmr.msra.gmra.mxu0 %vm310_vm1, %v976_v55  ;;  %1539 = vmatmul.mubr.msk.f32.vlgmr.msra.gmra.mxu1 %vm310_vm1, %v976_v55 }
  0x9c   : > { %1155 = vmatprep.subr.mxu0 %v971_v23  ;;  %1616 = vmatprep.subr.mxu1 %v972_v24 }
  0x9d   : > { %1156 = vmatpush1.msra.mxu0 %v970_v56  ;;  %1617 = vmatpush3.msra.mxu1 %v972_v24  ;;  %v2161_v24 = vrot.slane %v1301_v40, %v1321_v43  ;;  %v2163_v56 = vrot.slane %v1301_v40, %v1329_v44 }
  0x9e   : > { %1157 = vmatprep.subr.mxu0 %v964_v57  ;;  %1618 = vmatprep.subr.mxu1 %v965_v58  ;;  %v2165_v57 = vrot.slane %v1301_v40, %v1325_v45 }
  0x9f   : > { %1051 = vmatprep.mubr.f32.mxu0 %v1936_v0  ;;  %1128 = vmatprep.mubr.f32.mxu1 %v1936_v0 }
  0xa0   : > { %1158 = vmatpush1.msra.mxu0 %v963_v59  ;;  %1619 = vmatpush3.msra.mxu1 %v965_v58 }
  0xa1   : > { %1538 = vmatmul.mubr.msk.f32.gmra.mxu0 %vm310_vm1, %v2134_v50  ;;  %1540 = vmatmul.mubr.msk.f32.gmra.mxu1 %vm310_vm1, %v2134_v50 }
  0xa2   : > { %1159 = vmatprep.subr.mxu0 %v957_v60  ;;  %1620 = vmatprep.subr.mxu1 %v958_v61 }
  0xa3   : > { %1160 = vmatpush1.msra.mxu0 %v956_v62  ;;  %1621 = vmatpush3.msra.mxu1 %v958_v61 }
  0xa4   : > { %1161 = vmatprep.subr.mxu0 %v950_v63  ;;  %1622 = vmatprep.subr.mxu1 %v951_v1 }
  0xa5   : > { %1162 = vmatpush1.msra.mxu0 %v949_v2  ;;  %1623 = vmatpush3.msra.mxu1 %v951_v1 }
  0xa6   : > { %1163 = vmatprep.subr.mxu0 %v943_v3  ;;  %1624 = vmatprep.subr.mxu1 %v944_v4 }
  0xa7   : > { %1164 = vmatpush1.msra.mxu0 %v942_v5  ;;  %1625 = vmatpush3.msra.mxu1 %v944_v4 }
  0xa8   : > { %1165 = vmatprep.subr.mxu0 %v936_v6  ;;  %1626 = vmatprep.subr.mxu1 %v937_v7 }
  0xa9   : > { %1166 = vmatpush1.msra.mxu0 %v935_v8  ;;  %1199 = vmatprep.mubr.f32.mxu0 %v1936_v0 }
  0xaa   : > { %1627 = vmatpush3.msra.mxu1 %v937_v7  ;;  %1628 = vmatprep.mubr.msk.f32.mxu1 %vm310_vm1, %v976_v55 }
  0xab   : > { %1541 = vmatmul.mubr.msk.f32.vlgmr.msra.gmra.mxu0 %vm310_vm1, %v976_v55  ;;  %1629 = vmatmul.mubr.msk.f32.vlgmr.msra.gmra.mxu1 %vm310_vm1, %v2134_v50 }
  0xac   : > { %1205 = vmatprep.mubr.f32.mxu0 %v1936_v0 }
  0xaf   : > { %1542 = vmatmul.mubr.msk.f32.gmra.mxu0 %vm310_vm1, %v2134_v50 }
 0x11d   : > { %v381_v9 = vpop.f32.mrf.mxu0 }
 0x11e   : > { %v458_v14 = vpop.f32.mrf.mxu1 }
 0x11f   : > { %v383_v10 = vpop.f32.mrf.mxu0 }
 0x120   : > { %v460_v16 = vpop.f32.mrf.mxu1 }
 0x125   : > { %v387_v11 = vpop.f32.mrf.mxu0 }
 0x127   : > { %v389_v12 = vpop.f32.mrf.mxu0 }
 0x128   : > { %v464_v18 = vpop.f32.mrf.mxu1 }
 0x12a   : > { %v466_v20 = vpop.f32.mrf.mxu1 }
 0x12c   : > { %v535_v13 = vpop.f32.mrf.mxu0 }
 0x12e   : > { %v537_v15 = vpop.f32.mrf.mxu0  ;;  %v1600_v22 = vpop.f32.mrf.mxu1 }
 0x130   : > { %v612_v26 = vpop.f32.mrf.mxu1 }
 0x135   : > { %v541_v17 = vpop.f32.mrf.mxu0 }
 0x137   : > { %v543_v19 = vpop.f32.mrf.mxu0 }
 0x13c   : > { %v691_v21 = vpop.f32.mrf.mxu0  ;;  %v768_v0 = vpop.f32.mrf.mxu1 }
 0x13d   : > { %v692_v50 = vadd.f32 %v691_v21, %v381_v9  ;;  %v769_v51 = vadd.f32 %v768_v0, %v458_v14 }
 0x13e   : > { %v693_v25 = vpop.f32.mrf.mxu0  ;;  %v770_v28 = vpop.f32.mrf.mxu1 }
 0x13f   : > { %v694_v54 = vadd.f32 %v693_v25, %v383_v10  ;;  %v771_v58 = vadd.f32 %v770_v28, %v460_v16 }
 0x142   : > { %v697_v27 = vpop.f32.mrf.mxu0  ;;  %v774_v32 = vpop.f32.mrf.mxu1 }
 0x143   : > { %v698_v59 = vadd.f32 %v697_v27, %v387_v11  ;;  %v775_v62 = vadd.f32 %v774_v32, %v464_v18 }
 0x144   : > { %v699_v29 = vpop.f32.mrf.mxu0  ;;  %v776_v35 = vpop.f32.mrf.mxu1 }
 0x145   : > { %v2167_v63 = vadd.f32 %v699_v29, %v389_v12  ;;  %v2169_v1 = vadd.f32 %v776_v35, %v466_v20 }
 0x14c   : > { %v845_v30 = vpop.f32.mrf.mxu0  ;;  %v1615_v36 = vpop.f32.mrf.mxu1 }
 0x14d   : > { %v2171_v2 = vadd.f32 %v845_v30, %v535_v13  ;;  %v2175_v9 = vadd.f32 %v1615_v36, %v1600_v22 }
 0x14e   : > { %v847_v33 = vpop.f32.mrf.mxu0  ;;  %v922_v46 = vpop.f32.mrf.mxu1 }
 0x14f   : > { %v2177_v10 = vadd.f32 %v847_v33, %v537_v15  ;;  %v2179_v11 = vadd.f32 %v922_v46, %v612_v26 }
 0x151   : > { %v851_v37 = vpop.f32.mrf.mxu0 }
 0x152   : > { %v2181_v12 = vadd.f32 %v851_v37, %v541_v17 }
 0x153   : > { %v853_v47 = vpop.f32.mrf.mxu0 }
 0x154   : > { %v2183_v13 = vadd.f32 %v853_v47, %v543_v19 }
 0x15b   : > { %v1047_v55 = vpop.f32.mrf.mxu0  ;;  %v1124_v23 = vpop.f32.mrf.mxu1 }
 0x15c   : > { %v1287_v60 = vadd.f32 %v1047_v55, %v692_v50  ;;  %v1289_v61 = vadd.f32 %v1124_v23, %v769_v51 }
 0x15d   : > { %v1049_v3 = vpop.f32.mrf.mxu0  ;;  %v1126_v4 = vpop.f32.mrf.mxu1 }
 0x15e   : > { %v1338_v5 = vadd.f32 %v1306_v48, %v1287_v60  ;;  %v1340_v6 = vadd.f32 %v2155_v49, %v1289_v61  ;;  %v1288_v7 = vadd.f32 %v1049_v3, %v694_v54  ;;  %v1290_v8 = vadd.f32 %v1126_v4, %v771_v58 }
 0x160   : > { %v1632_v14 = vand.u32 2147483647, %v1338_v5  ;;  %v1634_v16 = vcvt.f32.s32 %v1338_v5  ;;  %v1648_v18 = vand.u32 2147483647, %v1340_v6  ;;  %v1637_v20 = vand.u32 2147483648, %v1338_v5 }
 0x161   : > { %v1650_v21 = vcvt.f32.s32 %v1340_v6  ;;  %v1339_v25 = vadd.f32 %v2157_v52, %v1288_v7  ;;  %v1341_v0 = vadd.f32 %v2159_v53, %v1290_v8  ;;  %v1053_v27 = vpop.f32.mrf.mxu0  ;;  %v1653_v19 = vand.u32 2147483648, %v1340_v6  ;;  %v1130_v31 = vpop.f32.mrf.mxu1 }
 0x162   : > { %vm2192_vm3 = vcmp.lt.f32.partialorder %v1632_v14, 8388608.0  ;;  %v1635_v17 = vcvt.s32.f32 %v1634_v16  ;;  %v1294_v22 = vadd.f32 %v1053_v27, %v698_v59  ;;  %vm2196_vm4 = vcmp.lt.f32.partialorder %v1648_v18, 8388608.0 }
 0x163   : > { %v1651_v28 = vcvt.s32.f32 %v1650_v21  ;;  %v1640_v29 = vand.u32 2147483647, %v1339_v25  ;;  %v1642_v30 = vcvt.f32.s32 %v1339_v25  ;;  %v1645_v33 = vand.u32 2147483648, %v1339_v25  ;;  %v1055_v60 = vpop.f32.mrf.mxu0  ;;  %v1132_v8 = vpop.f32.mrf.mxu1 }
 0x164   : > { %v1636_v32 = vand.u32 2147483647, %v1635_v17  ;;  %v1656_v34 = vand.u32 2147483647, %v1341_v0  ;;  %v1658_v35 = vcvt.f32.s32 %v1341_v0  ;;  %v1661_v38 = vand.u32 2147483648, %v1341_v0 }
 0x165   : > { %v1652_v36 = vand.u32 2147483647, %v1651_v28  ;;  %v1643_v37 = vcvt.s32.f32 %v1642_v30  ;;  %v1345_v39 = vadd.f32 %v1306_v48, %v1294_v22  ;;  %vm2201_vm5 = vcmp.lt.f32.partialorder %v1640_v29, 8388608.0 }
 0x166   : > { %v1638_v40 = vor.u32 %v1637_v20, %v1636_v32  ;;  %v1659_v42 = vcvt.s32.f32 %v1658_v35  ;;  %v1296_v43 = vadd.f32 %v1130_v31, %v775_v62  ;;  %vm2207_vm6 = vcmp.lt.f32.partialorder %v1656_v34, 8388608.0 }
 0x167   : > { %v1654_v44 = vor.u32 %v1653_v19, %v1652_v36  ;;  %v1644_v45 = vand.u32 2147483647, %v1643_v37  ;;  %v1688_v46 = vand.u32 2147483647, %v1345_v39  ;;  %v1690_v47 = vcvt.f32.s32 %v1345_v39 }
 0x168   : > { %v1639_v50 = vsel %vm2192_vm3, %v1638_v40, %v1338_v5  ;;  %v1660_v48 = vand.u32 2147483647, %v1659_v42  ;;  %v1347_v54 = vadd.f32 %v2155_v49, %v1296_v43  ;;  %v1693_v59 = vand.u32 2147483648, %v1345_v39 }
 0x169   : > { %v1545_v55 = vclamps-f32 %v1639_v50, 127.0  ;;  %v1655_v23 = vsel %vm2196_vm4, %v1654_v44, %v1340_v6  ;;  %v1646_v58 = vor.u32 %v1645_v33, %v1644_v45  ;;  %vm2219_vm7 = vcmp.lt.f32.partialorder %v1688_v46, 8388608.0 }
 0x16a   : > { %v1547_v61 = vclamps-f32 %v1655_v23, 127.0  ;;  %v1662_v62 = vor.u32 %v1661_v38, %v1660_v48  ;;  %v1691_v49 = vcvt.s32.f32 %v1690_v47  ;;  %v1704_v6 = vand.u32 2147483647, %v1347_v54 }
 0x16b   : > { %v1394_v4 = vmul.f32 0.007874016, %v1545_v55  ;;  %v1647_v5 = vsel %vm2201_vm5, %v1646_v58, %v1339_v25  ;;  %v1706_v7 = vcvt.f32.s32 %v1347_v54  ;;  %v1201_v14 = vpop.f32.mrf.mxu0  ;;  %v1709_v17 = vand.u32 2147483648, %v1347_v54  ;;  %v1630_v22 = vpop.f32.mrf.mxu1 }
 0x16c   : > { %v1396_v16 = vmul.f32 0.007874016, %v1547_v61  ;;  %v1546_v18 = vclamps-f32 %v1647_v5, 127.0  ;;  %v1663_v20 = vsel %vm2207_vm6, %v1662_v62, %v1341_v0  ;;  %v1692_v21 = vand.u32 2147483647, %v1691_v49 }
 0x16d   : > { %1408 = vst [vmem:[%s2217_s21] sm:$0xff] %v1394_v4  ;;  %v1548_v27 = vclamps-f32 %v1663_v20, 127.0  ;;  %v1707_v15 = vcvt.s32.f32 %v1706_v7  ;;  %v1295_v19 = vadd.f32 %v1055_v60, %v2167_v63  ;;  %v1297_v28 = vadd.f32 %v1132_v8, %v2169_v1  ;;  %v1203_v33 = vpop.f32.mrf.mxu0 }
 0x16e   : > { %1410 = vst [vmem:[%s2217_s21 + $0x10] sm:$0xff] %v1396_v16  ;;  %v1395_v25 = vmul.f32 0.007874016, %v1546_v18  ;;  %v1694_v26 = vor.u32 %v1693_v59, %v1692_v21  ;;  %v1291_v29 = vadd.f32 %v1201_v14, %v2171_v2  ;;  %vm2232_vm8 = vcmp.lt.f32.partialorder %v1704_v6, 8388608.0  ;;  %v1278_v18 = vpop.f32.mrf.mxu1 }
 0x16f   : > { %v1397_v30 = vmul.f32 0.007874016, %v1548_v27  ;;  %v1708_v31 = vand.u32 2147483647, %v1707_v15  ;;  %v1346_v32 = vadd.f32 %v2157_v52, %v1295_v19  ;;  %v1348_v34 = vadd.f32 %v2159_v53, %v1297_v28  ;;  %v1207_v59 = vpop.f32.mrf.mxu0 }
 0x170   : > { %1409 = vst [vmem:[%s2217_s21 + $0x8] sm:$0xff] %v1395_v25  ;;  %v1695_v63 = vsel %vm2219_vm7, %v1694_v26, %v1345_v39  ;;  %v1342_v35 = vadd.f32 %v2161_v24, %v1291_v29  ;;  %v1300_v1 = vadd.f32 %v1630_v22, %v2175_v9  ;;  %v1292_v42 = vadd.f32 %v1203_v33, %v2177_v10 }
 0x171   : > { %1411 = vst [vmem:[%s2217_s21 + $0x18] sm:$0xff] %v1397_v30  ;;  %v1552_v2 = vclamps-f32 %v1695_v63, 127.0  ;;  %v1710_v36 = vor.u32 %v1709_v17, %v1708_v31  ;;  %v1696_v37 = vand.u32 2147483647, %v1346_v32  ;;  %v1698_v38 = vcvt.f32.s32 %v1346_v32  ;;  %v1209_v17 = vpop.f32.mrf.mxu0 }
 0x172   : > { %v1701_v40 = vand.u32 2147483648, %v1346_v32  ;;  %v1712_v41 = vand.u32 2147483647, %v1348_v34  ;;  %v1714_v52 = vcvt.f32.s32 %v1348_v34  ;;  %v1717_v44 = vand.u32 2147483648, %v1348_v34 }
 0x173   : > { %v1401_v43 = vmul.f32 0.007874016, %v1552_v2  ;;  %v1711_v39 = vsel %vm2232_vm8, %v1710_v36, %v1347_v54  ;;  %v1699_v53 = vcvt.s32.f32 %v1698_v38  ;;  %vm2247_vm9 = vcmp.lt.f32.partialorder %v1696_v37, 8388608.0 }
 0x174   : > { %v1554_v45 = vclamps-f32 %v1711_v39, 127.0  ;;  %v1715_v46 = vcvt.s32.f32 %v1714_v52  ;;  %v1664_v47 = vand.u32 2147483647, %v1342_v35  ;;  %vm2252_vm10 = vcmp.lt.f32.partialorder %v1712_v41, 8388608.0 }
 0x175   : > { %1415 = vst [vmem:[%s2217_s21 + $0x38] sm:$0x3f] %v1401_v43  ;;  %v1700_v50 = vand.u32 2147483647, %v1699_v53  ;;  %v1666_v10 = vcvt.f32.s32 %v1342_v35  ;;  %v1351_v48 = vadd.f32 %v2163_v56, %v1300_v1  ;;  %v1669_v23 = vand.u32 2147483648, %v1342_v35 }
 0x176   : > { %v1403_v54 = vmul.f32 0.007874016, %v1554_v45  ;;  %v1716_v55 = vand.u32 2147483647, %v1715_v46  ;;  %v1343_v58 = vadd.f32 %v2165_v57, %v1292_v42  ;;  %vm2259_vm11 = vcmp.lt.f32.partialorder %v1664_v47, 8388608.0 }
 0x177   : > { %v1702_v60 = vor.u32 %v1701_v40, %v1700_v50  ;;  %v1667_v61 = vcvt.s32.f32 %v1666_v10  ;;  %v1736_v62 = vand.u32 2147483647, %v1351_v48  ;;  %v1738_v3 = vcvt.f32.s32 %v1351_v48 }
 0x178   : > { %1417 = vst [vmem:[%s2217_s21 + $0x48] sm:$0x3f] %v1403_v54  ;;  %v1718_v49 = vor.u32 %v1717_v44, %v1716_v55  ;;  %v1741_v5 = vand.u32 2147483648, %v1351_v48  ;;  %v1674_v6 = vcvt.f32.s32 %v1343_v58  ;;  %v1672_v16 = vand.u32 2147483647, %v1343_v58 }
 0x179   : > { %v1703_v7 = vsel %vm2247_vm9, %v1702_v60, %v1346_v32  ;;  %v1668_v8 = vand.u32 2147483647, %v1667_v61  ;;  %v1739_v14 = vcvt.s32.f32 %v1738_v3  ;;  %vm2267_vm12 = vcmp.lt.f32.partialorder %v1736_v62, 8388608.0 }
 0x17a   : > { %v1553_v20 = vclamps-f32 %v1703_v7, 127.0  ;;  %v1719_v21 = vsel %vm2252_vm10, %v1718_v49, %v1348_v34  ;;  %v1675_v15 = vcvt.s32.f32 %v1674_v6  ;;  %v1677_v26 = vand.u32 2147483648, %v1343_v58 }
 0x17b   : > { %v1555_v19 = vclamps-f32 %v1719_v21, 127.0  ;;  %v1670_v22 = vor.u32 %v1669_v23, %v1668_v8  ;;  %v1740_v25 = vand.u32 2147483647, %v1739_v14  ;;  %v1293_v30 = vadd.f32 %v1278_v18, %v2179_v11 }
 0x17c   : > { %v1402_v28 = vmul.f32 0.007874016, %v1553_v20  ;;  %v1676_v29 = vand.u32 2147483647, %v1675_v15  ;;  %v1298_v0 = vadd.f32 %v1207_v59, %v2181_v12  ;;  %v1299_v63 = vadd.f32 %v1209_v17, %v2183_v13 }
 0x17d   : > { %v1404_v31 = vmul.f32 0.007874016, %v1555_v19  ;;  %v1671_v32 = vsel %vm2259_vm11, %v1670_v22, %v1342_v35  ;;  %v1742_v33 = vor.u32 %v1741_v5, %v1740_v25  ;;  %v1344_v2 = vadd.f32 %v2163_v56, %v1293_v30 }
 0x17e   : > { %1416 = vst [vmem:[%s2217_s21 + $0x40] sm:$0x3f] %v1402_v28  ;;  %v1549_v34 = vclamps-f32 %v1671_v32, 127.0  ;;  %v1678_v1 = vor.u32 %v1677_v26, %v1676_v29  ;;  %v1349_v36 = vadd.f32 %v2161_v24, %v1298_v0  ;;  %vm1673_vm13 = vcmp.lt.f32.partialorder %v1672_v16, 8388608.0 }
 0x17f   : > { %1418 = vst [vmem:[%s2217_s21 + $0x50] sm:$0x3f] %v1404_v31  ;;  %v1743_v11 = vsel %vm2267_vm12, %v1742_v33, %v1351_v48  ;;  %v1350_v38 = vadd.f32 %v2165_v57, %v1299_v63  ;;  %v1682_v40 = vcvt.f32.s32 %v1344_v2  ;;  %v1680_v24 = vand.u32 2147483647, %v1344_v2 }
 0x180   : > { %v1398_v12 = vmul.f32 0.007874016, %v1549_v34  ;;  %v1558_v35 = vclamps-f32 %v1743_v11, 127.0  ;;  %v1679_v37 = vsel %vm1673_vm13, %v1678_v1, %v1343_v58  ;;  %v1722_v52 = vcvt.f32.s32 %v1349_v36 }
 0x181   : > { %v1550_v13 = vclamps-f32 %v1679_v37, 127.0  ;;  %v1683_v42 = vcvt.s32.f32 %v1682_v40  ;;  %v1730_v39 = vcvt.f32.s32 %v1350_v38  ;;  %v1685_v44 = vand.u32 2147483648, %v1344_v2 }
 0x182   : > { %1412 = vst [vmem:[%s2217_s21 + $0x20] sm:$0xff] %v1398_v12  ;;  %v1407_v41 = vmul.f32 0.007874016, %v1558_v35  ;;  %v1723_v43 = vcvt.s32.f32 %v1722_v52  ;;  %v1720_v45 = vand.u32 2147483647, %v1349_v36  ;;  %v1725_v46 = vand.u32 2147483648, %v1349_v36 }
 0x183   : > { %v1399_v56 = vmul.f32 0.007874016, %v1550_v13  ;;  %v1684_v53 = vand.u32 2147483647, %v1683_v42  ;;  %v1731_v47 = vcvt.s32.f32 %v1730_v39  ;;  %v1728_v57 = vand.u32 2147483647, %v1350_v38 }
 0x184   : > { %1421 = vst [vmem:[%s2217_s21 + $0x68] sm:$0x3f] %v1407_v41  ;;  %v1724_v9 = vand.u32 2147483647, %v1723_v43  ;;  %vm1681_vm14 = vcmp.lt.f32.partialorder %v1680_v24, 8388608.0  ;;  %v1733_v48 = vand.u32 2147483648, %v1350_v38 }
 0x185   : > { %1413 = vst [vmem:[%s2217_s21 + $0x28] sm:$0xff] %v1399_v56  ;;  %v1686_v50 = vor.u32 %v1685_v44, %v1684_v53  ;;  %v1732_v10 = vand.u32 2147483647, %v1731_v47  ;;  %vm1721_vm15 = vcmp.lt.f32.partialorder %v1720_v45, 8388608.0  ;;  %vm1729_vm0 = vcmp.lt.f32.partialorder %v1728_v57, 8388608.0 }
 0x186   : > { %v1726_v51 = vor.u32 %v1725_v46, %v1724_v9 }
 0x187   : > { %v1687_v54 = vsel %vm1681_vm14, %v1686_v50, %v1344_v2  ;;  %v1734_v58 = vor.u32 %v1733_v48, %v1732_v10 }
 0x188   : > { %v1551_v55 = vclamps-f32 %v1687_v54, 127.0  ;;  %v1727_v23 = vsel %vm1721_vm15, %v1726_v51, %v1349_v36 }
 0x189   : > { %v1556_v59 = vclamps-f32 %v1727_v23, 127.0  ;;  %v1735_v61 = vsel %vm1729_vm0, %v1734_v58, %v1350_v38 }
 0x18a   : > { %v1400_v60 = vmul.f32 0.007874016, %v1551_v55  ;;  %v1557_v3 = vclamps-f32 %v1735_v61, 127.0 }
 0x18b   : > { %v1405_v62 = vmul.f32 0.007874016, %v1556_v59 }
 0x18c   : > { %1414 = vst [vmem:[%s2217_s21 + $0x30] sm:$0xff] %v1400_v60  ;;  %v1406_v49 = vmul.f32 0.007874016, %v1557_v3 }
 0x18d   : > { %1419 = vst [vmem:[%s2217_s21 + $0x58] sm:$0x3f] %v1405_v62 }
 0x18e   : > { %1420 = vst [vmem:[%s2217_s21 + $0x60] sm:$0x3f] %v1406_v49 }
 0x18f PF: > { %p14_p11 = scmp.ge.s32.totalorder %s2019_s6, 4   ;;  %s2337_s12 = smov %s1919_s13 }
 0x190   : > { %s2338_s13 = smov %s1923_s14  ;;  %s2339_s14 = smov %s2030_s10 }
 0x191   : > { %s2340_s15 = smov %s2019_s6  ;;  %16 = sbr.rel (!%p14_p11) target bundleno = 4 (0x4), region = 80 }
 0x196   :  { %1443 = vsyncpa [#allocation3], 1 }
 0x197   :  { %1445 = vsyncpa [#allocation3 + $0x1], 1 }
 0x198   :  { %1446 = vsyncpa [#allocation5], 1 }

</bundles_post_ra>
